<compile_context>
chip_gen: v7x
topology: tpu7x:2x2x1
jax: 0.10.0
libtpu: 0.0.40
codegen_flags: <defaults>
</compile_context>

<pallas_src>
import functools

import jax
import jax.numpy as jnp
import numpy as np
from jax.experimental import pallas as pl
from jax.experimental.pallas import tpu as pltpu


# ------------------------------ helpers ------------------------------

def _round_up(x, m):
    return -(-x // m) * m


def _pick_div_tile(dim, desired, base):
    """Largest multiple of `base`, <= desired, that divides `dim` (dim % base == 0)."""
    t = max(base, min(desired, dim))
    while dim % t:
        t -= base
    return t


def _apply_activation(a, activation):
    if activation == 'relu':
        return jnp.maximum(a, 0.0)
    if activation == 'leaky relu':
        return jnp.where(a >= 0.0, a, 0.01 * a)
    if activation == 'tanh':
        return jnp.tanh(a)
    raise AssertionError(f'{activation} is not supported yet.')


# --------------------- fused path: whole MLP head in one pallas_call ---------------------

def _fused_mlp_head_kernel(x_ref, w1_ref, b1_ref, g_ref, bt_ref, w2_ref, b2_ref,
                           o_ref, acc_ref, *, m_true, eps, activation, compute_dtype):
    # program_id / num_programs hoisted to the top level (never call them inside pl.when).
    j = pl.program_id(0)
    nj = pl.num_programs(0)

    @pl.when(j == 0)
    def _():
        acc_ref[...] = jnp.zeros_like(acc_ref)

    # Linear 1 for this hidden-channel tile (f32 MXU accumulation).
    h = jnp.dot(x_ref[...], w1_ref[...], preferred_element_type=jnp.float32) + b1_ref[...]

    # Training-mode BatchNorm1d batch statistics over the real batch rows only.
    row = jax.lax.broadcasted_iota(jnp.int32, h.shape, 0)
    hm = jnp.where(row < m_true, h, 0.0)
    inv_m = 1.0 / m_true
    mean = jnp.sum(hm, axis=0, keepdims=True) * inv_m
    var = jnp.maximum(jnp.sum(hm * hm, axis=0, keepdims=True) * inv_m - mean * mean, 0.0)
    scale = g_ref[...] * jax.lax.rsqrt(var + eps)
    shift = bt_ref[...] - mean * scale

    a = _apply_activation(h * scale + shift, activation)

    # Linear 2 contribution of this hidden tile.
    acc_ref[...] += jnp.dot(a.astype(compute_dtype), w2_ref[...],
                            preferred_element_type=jnp.float32)

    @pl.when(j == nj - 1)
    def _():
        o_ref[...] = (acc_ref[...] + b2_ref[...]).astype(o_ref.dtype)


def _fused_vmem_bytes(Mp, Kp, th, Pp, cbytes):
    return (2 * Mp * Kp * cbytes        # x (double buffered)
            + 2 * Kp * th * cbytes      # W1 tile
            + 2 * th * Pp * cbytes      # W2 tile
            + 2 * 3 * th * 4            # b1 / gamma / beta tiles
            + 2 * Pp * 4                # b2
            + 2 * Mp * Pp * 4           # f32 output
            + Mp * Pp * 4               # f32 accumulator scratch
            + 2 * Mp * th * 4)          # h / activation temporaries (headroom)


def _choose_fused_hidden_tile(Mp, Kp, Hp, Pp, cbytes, budget=24 * 1024 * 1024):
    th = _pick_div_tile(Hp, 1024, 128)
    while th > 128 and _fused_vmem_bytes(Mp, Kp, th, Pp, cbytes) > budget:
        th = _pick_div_tile(Hp, th - 128, 128)
    if _fused_vmem_bytes(Mp, Kp, th, Pp, cbytes) > budget:
        return None
    return th


def _fused_mlp_head(x, w1, b1, gamma, beta, w2, b2, *, activation, eps,
                    compute_dtype, out_dtype, hidden_tile):
    M, K = x.shape
    H = w1.shape[1]
    P = w2.shape[1]
    Mp = _round_up(M, 16)
    Kp = _round_up(K, 128)
    Hp = _round_up(H, 128)
    Pp = _round_up(P, 128)
    th = _pick_div_tile(Hp, hidden_tile, 128)

    xp = jnp.pad(x, ((0, Mp - M), (0, Kp - K))) if (Mp, Kp) != (M, K) else x
    w1p = jnp.pad(w1, ((0, Kp - K), (0, Hp - H))) if (Kp, Hp) != (K, H) else w1
    w2p = jnp.pad(w2, ((0, Hp - H), (0, Pp - P))) if (Hp, Pp) != (H, P) else w2
    b1p = jnp.pad(b1.reshape(1, -1), ((0, 0), (0, Hp - H))).astype(jnp.float32)
    gp = jnp.pad(gamma.reshape(1, -1), ((0, 0), (0, Hp - H))).astype(jnp.float32)
    btp = jnp.pad(beta.reshape(1, -1), ((0, 0), (0, Hp - H))).astype(jnp.float32)
    b2p = jnp.pad(b2.reshape(1, -1), ((0, 0), (0, Pp - P))).astype(jnp.float32)
    xp = xp.astype(compute_dtype)
    w1p = w1p.astype(compute_dtype)
    w2p = w2p.astype(compute_dtype)

    kernel = functools.partial(_fused_mlp_head_kernel, m_true=M, eps=eps,
                               activation=activation, compute_dtype=compute_dtype)

    out = pl.pallas_call(
        kernel,
        out_shape=jax.ShapeDtypeStruct((Mp, Pp), out_dtype),
        grid_spec=pltpu.PrefetchScalarGridSpec(
            num_scalar_prefetch=0,
            grid=(Hp // th,),
            in_specs=[pl.BlockSpec((Mp, Kp), lambda j: (0, 0)),
                      pl.BlockSpec((Kp, th), lambda j: (0, j)),
                      pl.BlockSpec((1, th), lambda j: (0, j)),
                      pl.BlockSpec((1, th), lambda j: (0, j)),
                      pl.BlockSpec((1, th), lambda j: (0, j)),
                      pl.BlockSpec((th, Pp), lambda j: (j, 0)),
                      pl.BlockSpec((1, Pp), lambda j: (0, 0))],
            out_specs=pl.BlockSpec((Mp, Pp), lambda j: (0, 0)),
            scratch_shapes=[pltpu.VMEM((Mp, Pp), jnp.float32)]),
        compiler_params=pltpu.CompilerParams(
            dimension_semantics=("arbitrary",)),
    )(xp, w1p, b1p, gp, btp, w2p, b2p)
    return out[:M, :P]


# --------------- fallback kernel 1: Linear + bias + masked BN batch stats ---------------

def _linear_bias_stats_kernel(x_ref, w_ref, b_ref, h_ref, st_ref, acc_ref,
                              *, m_true, tm):
    i = pl.program_id(0)
    k = pl.program_id(2)
    nk = pl.num_programs(2)
    row_base = i * tm

    @pl.when(k == 0)
    def _():
        acc_ref[...] = jnp.zeros_like(acc_ref)

    acc_ref[...] += jnp.dot(x_ref[...], w_ref[...],
                            preferred_element_type=jnp.float32)

    @pl.when(k == nk - 1)
    def _():
        h = acc_ref[...] + b_ref[...]                       # (tm, tn) f32
        h_ref[...] = h.astype(h_ref.dtype)
        row = row_base + jax.lax.broadcasted_iota(jnp.int32, h.shape, 0)
        hm = jnp.where(row < m_true, h, 0.0)
        s = jnp.sum(hm, axis=0, keepdims=True)              # (1, tn)
        ss = jnp.sum(hm * hm, axis=0, keepdims=True)        # (1, tn)
        sub = jax.lax.broadcasted_iota(jnp.int32, st_ref.shape, 0)
        st_ref[...] = jnp.where(sub == 0, s, jnp.where(sub == 1, ss, 0.0))


def linear_bias_stats(x, w, b, *, tiles, h_dtype, compute_dtype):
    M, K = x.shape
    N = w.shape[1]
    tm_d, tk_d, tn_d = tiles
    Mp = _round_up(M, 16)
    Kp = _round_up(K, 128)
    Np = _round_up(N, 128)
    tm = _pick_div_tile(Mp, tm_d, 16)
    tk = _pick_div_tile(Kp, tk_d, 128)
    tn = _pick_div_tile(Np, tn_d, 128)

    xp = jnp.pad(x, ((0, Mp - M), (0, Kp - K))) if (Mp, Kp) != (M, K) else x
    wp = jnp.pad(w, ((0, Kp - K), (0, Np - N))) if (Kp, Np) != (K, N) else w
    bp = jnp.pad(b.reshape(1, -1), ((0, 0), (0, Np - N))).astype(jnp.float32)
    xp = xp.astype(compute_dtype)
    wp = wp.astype(compute_dtype)

    gm, gn, gk = Mp // tm, Np // tn, Kp // tk
    kernel = functools.partial(_linear_bias_stats_kernel, m_true=M, tm=tm)

    h, st = pl.pallas_call(
        kernel,
        out_shape=(jax.ShapeDtypeStruct((Mp, Np), h_dtype),
                   jax.ShapeDtypeStruct((gm * 8, Np), jnp.float32)),
        grid_spec=pltpu.PrefetchScalarGridSpec(
            num_scalar_prefetch=0,
            grid=(gm, gn, gk),
            in_specs=[pl.BlockSpec((tm, tk), lambda i, j, k: (i, k)),
                      pl.BlockSpec((tk, tn), lambda i, j, k: (k, j)),
                      pl.BlockSpec((1, tn), lambda i, j, k: (0, j))],
            out_specs=[pl.BlockSpec((tm, tn), lambda i, j, k: (i, j)),
                       pl.BlockSpec((8, tn), lambda i, j, k: (i, j))],
            scratch_shapes=[pltpu.VMEM((tm, tn), jnp.float32)]),
        compiler_params=pltpu.CompilerParams(
            dimension_semantics=("parallel", "parallel", "arbitrary")),
    )(xp, wp, bp)

    st = st.reshape(gm, 8, Np)
    colsum = jnp.sum(st[:, 0, :N], axis=0)
    colsumsq = jnp.sum(st[:, 1, :N], axis=0)
    return h, colsum, colsumsq


# ------------- fallback kernel 2: BN-apply + activation fused into Linear 2 -------------

def _bn_act_linear_kernel(h_ref, sc_ref, sh_ref, w_ref, b_ref, o_ref, acc_ref,
                          *, activation, compute_dtype):
    k = pl.program_id(2)
    nk = pl.num_programs(2)

    @pl.when(k == 0)
    def _():
        acc_ref[...] = jnp.zeros_like(acc_ref)

    a = h_ref[...].astype(jnp.float32) * sc_ref[...] + sh_ref[...]
    a = _apply_activation(a, activation)
    acc_ref[...] += jnp.dot(a.astype(compute_dtype), w_ref[...],
                            preferred_element_type=jnp.float32)

    @pl.when(k == nk - 1)
    def _():
        o_ref[...] = (acc_ref[...] + b_ref[...]).astype(o_ref.dtype)


def bn_act_linear(h, scale, shift, w, b, *, tiles, activation, out_dtype, compute_dtype):
    Mp, Kh = h.shape                       # already padded (16-, 128-aligned)
    Kr, N = w.shape
    tm_d, tk_d, tn_d = tiles
    Np = _round_up(N, 128)
    tm = _pick_div_tile(Mp, tm_d, 16)
    tk = _pick_div_tile(Kh, tk_d, 128)
    # tanh recompute hits the single-slot EUP on every j-tile -> use a full-width output
    # tile when reasonable; relu/leaky-relu recompute is cheap VPU filler.
    tn_goal = min(Np, 2048) if activation == 'tanh' else tn_d
    tn = _pick_div_tile(Np, tn_goal, 128)

    scp = jnp.pad(scale.reshape(1, -1).astype(jnp.float32), ((0, 0), (0, Kh - Kr)))
    shp = jnp.pad(shift.reshape(1, -1).astype(jnp.float32), ((0, 0), (0, Kh - Kr)))
    wp = jnp.pad(w, ((0, Kh - Kr), (0, Np - N))) if (Kh, Np) != (Kr, N) else w
    bp = jnp.pad(b.reshape(1, -1), ((0, 0), (0, Np - N))).astype(jnp.float32)
    wp = wp.astype(compute_dtype)

    gm, gn, gk = Mp // tm, Np // tn, Kh // tk
    kernel = functools.partial(_bn_act_linear_kernel, activation=activation,
                               compute_dtype=compute_dtype)

    out = pl.pallas_call(
        kernel,
        out_shape=jax.ShapeDtypeStruct((Mp, Np), out_dtype),
        grid_spec=pltpu.PrefetchScalarGridSpec(
            num_scalar_prefetch=0,
            grid=(gm, gn, gk),
            in_specs=[pl.BlockSpec((tm, tk), lambda i, j, k: (i, k)),
                      pl.BlockSpec((1, tk), lambda i, j, k: (0, k)),
                      pl.BlockSpec((1, tk), lambda i, j, k: (0, k)),
                      pl.BlockSpec((tk, tn), lambda i, j, k: (k, j)),
                      pl.BlockSpec((1, tn), lambda i, j, k: (0, j))],
            out_specs=pl.BlockSpec((tm, tn), lambda i, j, k: (i, j)),
            scratch_shapes=[pltpu.VMEM((tm, tn), jnp.float32)]),
        compiler_params=pltpu.CompilerParams(
            dimension_semantics=("parallel", "parallel", "arbitrary")),
    )(h, scp, shp, wp, bp)
    return out


# ------------------------------ MLPHead ------------------------------

def build_mlp_head_params(key, in_channels, mlp_scale_factor, projection_size):
    hidden = int(round(mlp_scale_factor * in_channels))
    k1, k2 = jax.random.split(key)
    # nn.init.kaiming_normal_ on Linear weight (out, in): fan_in = in, std = sqrt(2/fan_in)
    w1 = jax.random.normal(k1, (in_channels, hidden), jnp.float32) * np.sqrt(2.0 / in_channels)
    w2 = jax.random.normal(k2, (hidden, projection_size), jnp.float32) * np.sqrt(2.0 / hidden)
    return {
        'w1': w1, 'b1': jnp.zeros((hidden,), jnp.float32),            # bias init = 0
        'gamma': jnp.ones((hidden,), jnp.float32),                    # BatchNorm1d defaults
        'beta': jnp.zeros((hidden,), jnp.float32),
        'w2': w2, 'b2': jnp.zeros((projection_size,), jnp.float32),
    }


def mlp_head_forward(params, x, *, activation='relu', eps=1e-5,
                     compute_dtype=jnp.bfloat16, force_two_pass=False):
    M, K = x.shape
    H = params['w1'].shape[1]
    P = params['w2'].shape[1]
    Mp = _round_up(M, 16)
    Kp = _round_up(K, 128)
    Hp = _round_up(H, 128)
    Pp = _round_up(P, 128)
    cbytes = np.dtype(compute_dtype).itemsize

    hidden_tile = None
    if not force_two_pass and Mp <= 1024:
        hidden_tile = _choose_fused_hidden_tile(Mp, Kp, Hp, Pp, cbytes)

    if hidden_tile is not None:
        # Fully fused: one pallas_call, hidden activations never leave VMEM.
        return _fused_mlp_head(x, params['w1'], params['b1'], params['gamma'],
                               params['beta'], params['w2'], params['b2'],
                               activation=activation, eps=eps,
                               compute_dtype=compute_dtype, out_dtype=jnp.float32,
                               hidden_tile=hidden_tile)

    # Large-batch fallback: two tiled kernels.
    tiles = (512, 256, 256)
    h, colsum, colsumsq = linear_bias_stats(
        x, params['w1'], params['b1'], tiles=tiles,
        h_dtype=compute_dtype, compute_dtype=compute_dtype)

    mean = colsum / M
    var = jnp.maximum(colsumsq / M - mean * mean, 0.0)
    scale = params['gamma'] * jax.lax.rsqrt(var + eps)
    shift = params['beta'] - mean * scale

    out = bn_act_linear(h, scale, shift, params['w2'], params['b2'], tiles=tiles,
                        activation=activation, out_dtype=jnp.float32,
                        compute_dtype=compute_dtype)
    return out[:M, :P]


def mlp_head_reference(params, x, *, activation='relu', eps=1e-5):
    h = x @ params['w1'] + params['b1'].reshape(1, -1)
    mean = jnp.mean(h, axis=0)
    var = jnp.var(h, axis=0)
    y = (h - mean) * jax.lax.rsqrt(var + eps) * params['gamma'] + params['beta']
    y = _apply_activation(y, activation)
    return y @ params['w2'] + params['b2'].reshape(1, -1)


if __name__ == "__main__":
    key = jax.random.PRNGKey(0)
    pkey, xkey = jax.random.split(key)

    batch, in_channels = 20, 128                  # exercises batch padding / masked stats
    mlp_scale_factor, projection_size = 2.0, 128  # hidden = 256

    params = build_mlp_head_params(pkey, in_channels, mlp_scale_factor, projection_size)
    x = jax.random.normal(xkey, (batch, in_channels), jnp.float32)

    # Fused single-kernel path.
    for act in ('relu', 'tanh'):
        fwd = jax.jit(functools.partial(mlp_head_forward, activation=act))
        out = jax.block_until_ready(fwd(params, x))
        assert out.shape == (batch, projection_size), out.shape
        assert bool(jnp.all(jnp.isfinite(out)))
        ref = mlp_head_reference(params, x, activation=act)
        rel = float(jnp.max(jnp.abs(out - ref)) / (jnp.max(jnp.abs(ref)) + 1e-6))
        assert rel < 5e-2, f"{act}: fused max relative error {rel}"

    # Two-kernel fallback path (used for large batches) on the same small problem.
    fwd2 = jax.jit(functools.partial(mlp_head_forward, activation='relu',
                                     force_two_pass=True))
    out2 = jax.block_until_ready(fwd2(params, x))
    ref2 = mlp_head_reference(params, x, activation='relu')
    rel2 = float(jnp.max(jnp.abs(out2 - ref2)) / (jnp.max(jnp.abs(ref2)) + 1e-6))
    assert rel2 < 5e-2, f"fallback max relative error {rel2}"

    print("KERNEL_OK")
</pallas_src>

<mosaic_0001>
module attributes {stable_mosaic.version = 11 : i64} {
  func.func @_fused_mlp_head_kernel(%arg0: i32, %arg1: memref<32x128xbf16, #tpu.memory_space<vmem>>, %arg2: memref<128x256xbf16, #tpu.memory_space<vmem>>, %arg3: memref<1x256xf32, #tpu.memory_space<vmem>>, %arg4: memref<1x256xf32, #tpu.memory_space<vmem>>, %arg5: memref<1x256xf32, #tpu.memory_space<vmem>>, %arg6: memref<256x128xbf16, #tpu.memory_space<vmem>>, %arg7: memref<1x128xf32, #tpu.memory_space<vmem>>, %arg8: memref<32x128xf32, #tpu.memory_space<vmem>>, %arg9: memref<32x128xf32, #tpu.memory_space<vmem>>) attributes {dimension_semantics = [#tpu.dimension_semantics<arbitrary>], iteration_bounds = array<i64: 1>, scalar_prefetch = 0 : i64, scratch_operands = 1 : i64, tpu.core_type = #tpu.core_type<tc>, window_params = [{pipeline_mode = #tpu.pipeline_mode<synchronous>, transform_indices = @transform_0, window_bounds = array<i64: 32, 128>}, {transform_indices = @transform_1, window_bounds = array<i64: 128, 256>}, {transform_indices = @transform_2, window_bounds = array<i64: 1, 256>}, {transform_indices = @transform_3, window_bounds = array<i64: 1, 256>}, {transform_indices = @transform_4, window_bounds = array<i64: 1, 256>}, {transform_indices = @transform_5, window_bounds = array<i64: 256, 128>}, {pipeline_mode = #tpu.pipeline_mode<synchronous>, transform_indices = @transform_6, window_bounds = array<i64: 1, 128>}, {pipeline_mode = #tpu.pipeline_mode<synchronous>, transform_indices = @transform_7, window_bounds = array<i64: 32, 128>}]} {
    %c0_i32 = arith.constant 0 : i32
    %0 = arith.cmpi eq, %arg0, %c0_i32 : i32
    %1 = arith.extui %0 : i1 to i32
    %c0_i32_0 = arith.constant 0 : i32
    %2 = arith.cmpi ne, %1, %c0_i32_0 : i32
    scf.if %2 {
      %cst_27 = arith.constant 0.000000e+00 : f32
      %50 = vector.broadcast %cst_27 : f32 to vector<32x128xf32>
      %c0_28 = arith.constant 0 : index
      %c0_29 = arith.constant 0 : index
      %51 = vector.load %arg9[%c0_28, %c0_29] : memref<32x128xf32, #tpu.memory_space<vmem>>, vector<32x128xf32>
      tpu.vector_store %arg9[%c0_28, %c0_29], %50 {strides = array<i32>} : memref<32x128xf32, #tpu.memory_space<vmem>>, vector<32x128xf32>,
    } else {
    }
    %c0 = arith.constant 0 : index
    %c0_1 = arith.constant 0 : index
    %3 = vector.load %arg1[%c0, %c0_1] : memref<32x128xbf16, #tpu.memory_space<vmem>>, vector<32x128xbf16>
    %c0_2 = arith.constant 0 : index
    %c0_3 = arith.constant 0 : index
    %4 = vector.load %arg2[%c0_2, %c0_3] : memref<128x256xbf16, #tpu.memory_space<vmem>>, vector<128x256xbf16>
    %cst = arith.constant dense<0.000000e+00> : vector<32x256xf32>
    %5 = tpu.matmul %3, %4, %cst {dimension_numbers = #tpu.dot_dimension_numbers<[1], [0], [0], [1], [0, 0, 1, 1], [], []>} : vector<32x128xbf16>, vector<128x256xbf16>, vector<32x256xf32> -> vector<32x256xf32>
    %c0_4 = arith.constant 0 : index
    %c0_5 = arith.constant 0 : index
    %6 = vector.load %arg3[%c0_4, %c0_5] : memref<1x256xf32, #tpu.memory_space<vmem>>, vector<1x256xf32>
    %7 = vector.broadcast %6 : vector<1x256xf32> to vector<32x256xf32>
    %8 = arith.addf %5, %7 : vector<32x256xf32>
    %9 = tpu.iota {dimensions = array<i32: 0>} : vector<32x256xi32>
    %c20_i32 = arith.constant 20 : i32
    %10 = vector.broadcast %c20_i32 : i32 to vector<32x256xi32>
    %11 = arith.cmpi slt, %9, %10 : vector<32x256xi32>
    %cst_6 = arith.constant 0.000000e+00 : f32
    %12 = vector.broadcast %cst_6 : f32 to vector<32x256xf32>
    %13 = arith.select %11, %8, %12 : vector<32x256xi1>, vector<32x256xf32>
    %cst_7 = arith.constant dense<0.000000e+00> : vector<256xf32>
    %14 = vector.multi_reduction <add>, %13, %cst_7 [0] : vector<32x256xf32> to vector<256xf32>
    %15 = vector.shape_cast %14 : vector<256xf32> to vector<1x256xf32>
    %cst_8 = arith.constant 5.000000e-02 : f32
    %16 = vector.broadcast %cst_8 : f32 to vector<1x256xf32>
    %17 = arith.mulf %15, %16 : vector<1x256xf32>
    %18 = arith.mulf %13, %13 : vector<32x256xf32>
    %cst_9 = arith.constant dense<0.000000e+00> : vector<256xf32>
    %19 = vector.multi_reduction <add>, %18, %cst_9 [0] : vector<32x256xf32> to vector<256xf32>
    %20 = vector.shape_cast %19 : vector<256xf32> to vector<1x256xf32>
    %cst_10 = arith.constant 5.000000e-02 : f32
    %21 = vector.broadcast %cst_10 : f32 to vector<1x256xf32>
    %22 = arith.mulf %20, %21 : vector<1x256xf32>
    %23 = arith.mulf %17, %17 : vector<1x256xf32>
    %24 = arith.subf %22, %23 : vector<1x256xf32>
    %cst_11 = arith.constant 0.000000e+00 : f32
    %25 = vector.broadcast %cst_11 : f32 to vector<1x256xf32>
    %26 = arith.maximumf %24, %25 : vector<1x256xf32>
    %c0_12 = arith.constant 0 : index
    %c0_13 = arith.constant 0 : index
    %27 = vector.load %arg4[%c0_12, %c0_13] : memref<1x256xf32, #tpu.memory_space<vmem>>, vector<1x256xf32>
    %cst_14 = arith.constant 9.99999974E-6 : f32
    %28 = vector.broadcast %cst_14 : f32 to vector<1x256xf32>
    %29 = arith.addf %26, %28 : vector<1x256xf32>
    %30 = math.rsqrt %29 : vector<1x256xf32>
    %31 = arith.mulf %27, %30 : vector<1x256xf32>
    %c0_15 = arith.constant 0 : index
    %c0_16 = arith.constant 0 : index
    %32 = vector.load %arg5[%c0_15, %c0_16] : memref<1x256xf32, #tpu.memory_space<vmem>>, vector<1x256xf32>
    %33 = arith.mulf %17, %31 : vector<1x256xf32>
    %34 = arith.subf %32, %33 : vector<1x256xf32>
    %35 = vector.broadcast %31 : vector<1x256xf32> to vector<32x256xf32>
    %36 = arith.mulf %8, %35 : vector<32x256xf32>
    %37 = vector.broadcast %34 : vector<1x256xf32> to vector<32x256xf32>
    %38 = arith.addf %36, %37 : vector<32x256xf32>
    %cst_17 = arith.constant 0.000000e+00 : f32
    %39 = vector.broadcast %cst_17 : f32 to vector<32x256xf32>
    %40 = arith.maximumf %38, %39 : vector<32x256xf32>
    %c0_18 = arith.constant 0 : index
    %c0_19 = arith.constant 0 : index
    %41 = vector.load %arg9[%c0_18, %c0_19] : memref<32x128xf32, #tpu.memory_space<vmem>>, vector<32x128xf32>
    %42 = arith.truncf %40 : vector<32x256xf32> to vector<32x256xbf16>
    %c0_20 = arith.constant 0 : index
    %c0_21 = arith.constant 0 : index
    %43 = vector.load %arg6[%c0_20, %c0_21] : memref<256x128xbf16, #tpu.memory_space<vmem>>, vector<256x128xbf16>
    %cst_22 = arith.constant dense<0.000000e+00> : vector<32x128xf32>
    %44 = tpu.matmul %42, %43, %cst_22 {dimension_numbers = #tpu.dot_dimension_numbers<[1], [0], [0], [1], [0, 0, 1, 1], [], []>} : vector<32x256xbf16>, vector<256x128xbf16>, vector<32x128xf32> -> vector<32x128xf32>
    %45 = arith.addf %41, %44 : vector<32x128xf32>
    %c0_23 = arith.constant 0 : index
    %c0_24 = arith.constant 0 : index
    %46 = vector.load %arg9[%c0_23, %c0_24] : memref<32x128xf32, #tpu.memory_space<vmem>>, vector<32x128xf32>
    tpu.vector_store %arg9[%c0_23, %c0_24], %45 {strides = array<i32>} : memref<32x128xf32, #tpu.memory_space<vmem>>, vector<32x128xf32>,
    %c0_i32_25 = arith.constant 0 : i32
    %47 = arith.cmpi eq, %arg0, %c0_i32_25 : i32
    %48 = arith.extui %47 : i1 to i32
    %c0_i32_26 = arith.constant 0 : i32
    %49 = arith.cmpi ne, %48, %c0_i32_26 : i32
    scf.if %49 {
      %c0_27 = arith.constant 0 : index
      %c0_28 = arith.constant 0 : index
      %50 = vector.load %arg9[%c0_27, %c0_28] : memref<32x128xf32, #tpu.memory_space<vmem>>, vector<32x128xf32>
      %c0_29 = arith.constant 0 : index
      %c0_30 = arith.constant 0 : index
      %51 = vector.load %arg7[%c0_29, %c0_30] : memref<1x128xf32, #tpu.memory_space<vmem>>, vector<1x128xf32>
      %52 = vector.broadcast %51 : vector<1x128xf32> to vector<32x128xf32>
      %53 = arith.addf %50, %52 : vector<32x128xf32>
      %c0_31 = arith.constant 0 : index
      %c0_32 = arith.constant 0 : index
      %54 = vector.load %arg8[%c0_31, %c0_32] : memref<32x128xf32, #tpu.memory_space<vmem>>, vector<32x128xf32>
      tpu.vector_store %arg8[%c0_31, %c0_32], %53 {strides = array<i32>} : memref<32x128xf32, #tpu.memory_space<vmem>>, vector<32x128xf32>,
    } else {
    }
    return
  }
  func.func @transform_0(%arg0: i32) -> (i32, i32) {
    %c0_i32 = arith.constant 0 : i32
    %c0_i32_0 = arith.constant 0 : i32
    %c0_i32_1 = arith.constant 0 : i32
    return %c0_i32, %c0_i32_0 : i32, i32
  }
  func.func @transform_1(%arg0: i32) -> (i32, i32) {
    %c0_i32 = arith.constant 0 : i32
    %c0_i32_0 = arith.constant 0 : i32
    return %c0_i32, %arg0 : i32, i32
  }
  func.func @transform_2(%arg0: i32) -> (i32, i32) {
    %c0_i32 = arith.constant 0 : i32
    %c0_i32_0 = arith.constant 0 : i32
    return %c0_i32, %arg0 : i32, i32
  }
  func.func @transform_3(%arg0: i32) -> (i32, i32) {
    %c0_i32 = arith.constant 0 : i32
    %c0_i32_0 = arith.constant 0 : i32
    return %c0_i32, %arg0 : i32, i32
  }
  func.func @transform_4(%arg0: i32) -> (i32, i32) {
    %c0_i32 = arith.constant 0 : i32
    %c0_i32_0 = arith.constant 0 : i32
    return %c0_i32, %arg0 : i32, i32
  }
  func.func @transform_5(%arg0: i32) -> (i32, i32) {
    %c0_i32 = arith.constant 0 : i32
    %c0_i32_0 = arith.constant 0 : i32
    return %arg0, %c0_i32 : i32, i32
  }
  func.func @transform_6(%arg0: i32) -> (i32, i32) {
    %c0_i32 = arith.constant 0 : i32
    %c0_i32_0 = arith.constant 0 : i32
    %c0_i32_1 = arith.constant 0 : i32
    return %c0_i32, %c0_i32_0 : i32, i32
  }
  func.func @transform_7(%arg0: i32) -> (i32, i32) {
    %c0_i32 = arith.constant 0 : i32
    %c0_i32_0 = arith.constant 0 : i32
    %c0_i32_1 = arith.constant 0 : i32
    return %c0_i32, %c0_i32_0 : i32, i32
  }
}

</mosaic_0001>

<bundles_post_ra>
// kernel: mlp_head_forward.1
= control target key start
LH: loop header
LB: loop body
LE: loop exit
PB: predicated region body
PF: predicated region fallthrough
CT: control target
= control target key end

     0   :  { %v705_v1 = vmov 0   ;;  %v57_v35 = vlaneseq  ;;  %s930_s1 = inlined_call_operand.vmem [shape: bf16[128,256], index: 1, kind: input, shape index: {}]   ;;  %s931_s0 = inlined_call_operand.vmem [shape: bf16[32,128], index: 0, kind: input, shape index: {}]   ;;  %s932_s5 = inlined_call_operand.vmem [shape: bf16[256,128], index: 5, kind: input, shape index: {}]   ;;  %s933_s2 = inlined_call_operand.vmem [shape: f32[1,256], index: 2, kind: input, shape index: {}]   ;;  %s934_s3 = inlined_call_operand.vmem [shape: f32[1,256], index: 3, kind: input, shape index: {}]   ;;  %s935_s4 = inlined_call_operand.vmem [shape: f32[1,256], index: 4, kind: input, shape index: {}]   ;;  %s936_s6 = inlined_call_operand.vmem [shape: f32[1,128], index: 6, kind: input, shape index: {}]   ;;  %s937_s7 = inlined_call_operand.vmem [shape: f32[32,128], index: 7, kind: output, shape index: {}]  }
   0x1   :  { %v659_v0 = vld [vmem:[%s930_s1 + $0x4] ss:$8 sps:$4 sm:$0xff]   ;;  %191 = vmatprep.mubr.bf16.mxu0 %v705_v1  ;;  %v661_v2 = vld [vmem:[%s930_s1] ss:$8 sps:$4 sm:$0xff]   ;;  %v662_v3 = vld [vmem:[%s930_s1 + $0x14] ss:$8 sps:$4 sm:$0xff]  }
   0x2   :  { %159 = vmatprep.subr.bf16.mxu0 %v659_v0  ;;  %v664_v4 = vld [vmem:[%s930_s1 + $0x10] ss:$8 sps:$4 sm:$0xff]   ;;  %v665_v5 = vld [vmem:[%s930_s1 + $0x24] ss:$8 sps:$4 sm:$0xff]   ;;  %v667_v6 = vld [vmem:[%s930_s1 + $0x20] ss:$8 sps:$4 sm:$0xff]  }
   0x3   :  { %160 = vmatpush1.bf16.msra.mxu0 %v661_v2  ;;  %v668_v7 = vld [vmem:[%s930_s1 + $0x34] ss:$8 sps:$4 sm:$0xff]   ;;  %v670_v8 = vld [vmem:[%s930_s1 + $0x30] ss:$8 sps:$4 sm:$0xff]   ;;  %v671_v9 = vld [vmem:[%s930_s1 + $0x44] ss:$8 sps:$4 sm:$0xff]  }
   0x4   :  { %161 = vmatprep.subr.bf16.mxu0 %v662_v3  ;;  %v673_v10 = vld [vmem:[%s930_s1 + $0x40] ss:$8 sps:$4 sm:$0xff]   ;;  %v674_v11 = vld [vmem:[%s930_s1 + $0x54] ss:$8 sps:$4 sm:$0xff]   ;;  %v676_v12 = vld [vmem:[%s930_s1 + $0x50] ss:$8 sps:$4 sm:$0xff]  }
   0x5   :  { %v677_v13 = vld [vmem:[%s930_s1 + $0x64] ss:$8 sps:$4 sm:$0xff]   ;;  %v679_v14 = vld [vmem:[%s930_s1 + $0x60] ss:$8 sps:$4 sm:$0xff]   ;;  %v680_v15 = vld [vmem:[%s930_s1 + $0x74] ss:$8 sps:$4 sm:$0xff]  }
   0x6   :  { %v682_v16 = vld [vmem:[%s930_s1 + $0x70] ss:$8 sps:$4 sm:$0xff]   ;;  %v683_v17 = vld [vmem:[%s931_s0] sm:$0xff]   ;;  %v684_v18 = vld [vmem:[%s931_s0 + $0x8] sm:$0xff]   ;;  %v849_v36 = vshrl.u32 %v57_v35, 7 }
   0x7   :  { %162 = vmatpush1.bf16.msra.mxu0 %v664_v4  ;;  %v685_v19 = vld [vmem:[%s932_s5 + $0x40] sm:$0xff]   ;;  %v687_v21 = vld [vmem:[%s932_s5 + $0x48] sm:$0xff]   ;;  %v689_v23 = vld [vmem:[%s932_s5 + $0x50] sm:$0xff]  }
   0x8   :  { %163 = vmatprep.subr.bf16.mxu0 %v665_v5  ;;  %v686_v20 = vld [vmem:[%s932_s5] sm:$0xff]   ;;  %629 = vmatprep.subr.bf16.mxu1 %v685_v19  ;;  %v688_v22 = vld [vmem:[%s932_s5 + $0x8] sm:$0xff]   ;;  %v690_v24 = vld [vmem:[%s932_s5 + $0x10] sm:$0xff]   ;;  %v852_v37 = vsub.s32 0, %v849_v36  ;;  %v858_v39 = vsub.s32 1, %v849_v36  ;;  %v215_v50 = vadd.s32 16, %v849_v36 }
   0x9   :  { %630 = vmatpush3.bf16.msra.mxu1 %v686_v20  ;;  %v691_v25 = vld [vmem:[%s932_s5 + $0x58] sm:$0xff]   ;;  %v693_v27 = vld [vmem:[%s932_s5 + $0x60] sm:$0xff]   ;;  %v695_v29 = vld [vmem:[%s932_s5 + $0x68] sm:$0xff]  }
   0xa   :  { %631 = vmatprep.subr.bf16.mxu1 %v687_v21  ;;  %v692_v26 = vld [vmem:[%s932_s5 + $0x18] sm:$0xff]   ;;  %v694_v28 = vld [vmem:[%s932_s5 + $0x20] sm:$0xff]   ;;  %v696_v30 = vld [vmem:[%s932_s5 + $0x28] sm:$0xff]   ;;  %vm219_vm0 = vcmp.lt.s32.totalorder %v215_v50, 20 }
   0xb   :  { %164 = vmatpush1.bf16.msra.mxu0 %v667_v6  ;;  %v697_v31 = vld [vmem:[%s932_s5 + $0x70] sm:$0xff]   ;;  %v699_v33 = vld [vmem:[%s932_s5 + $0x78] sm:$0xff]   ;;  %v55_v38 = vld [vmem:[%s933_s2] sm:$0x3] }
   0xc   :  { %165 = vmatprep.subr.bf16.mxu0 %v668_v7  ;;  %v698_v32 = vld [vmem:[%s932_s5 + $0x30] sm:$0xff]   ;;  %v700_v34 = vld [vmem:[%s932_s5 + $0x38] sm:$0xff]   ;;  %v60_v40 = vrot.slane %v55_v38, %v852_v37  ;;  %v862_v41 = vrot.slane %v55_v38, %v858_v39 }
   0xd   :  { %632 = vmatpush3.bf16.msra.mxu1 %v688_v22 }
   0xe   :  { %633 = vmatprep.subr.bf16.mxu1 %v689_v23 }
   0xf   :  { %166 = vmatpush1.bf16.msra.mxu0 %v670_v8 }
  0x10   :  { %167 = vmatprep.subr.bf16.mxu0 %v671_v9 }
  0x11   :  { %634 = vmatpush3.bf16.msra.mxu1 %v690_v24 }
  0x12   :  { %635 = vmatprep.subr.bf16.mxu1 %v691_v25 }
  0x13   :  { %168 = vmatpush1.bf16.msra.mxu0 %v673_v10 }
  0x14   :  { %169 = vmatprep.subr.bf16.mxu0 %v674_v11 }
  0x15   :  { %636 = vmatpush3.bf16.msra.mxu1 %v692_v26 }
  0x16   :  { %637 = vmatprep.subr.bf16.mxu1 %v693_v27 }
  0x17   :  { %170 = vmatpush1.bf16.msra.mxu0 %v676_v12 }
  0x18   :  { %171 = vmatprep.subr.bf16.mxu0 %v677_v13 }
  0x19   :  { %638 = vmatpush3.bf16.msra.mxu1 %v694_v28 }
  0x1a   :  { %639 = vmatprep.subr.bf16.mxu1 %v695_v29 }
  0x1b   :  { %172 = vmatpush1.bf16.msra.mxu0 %v679_v14 }
  0x1c   :  { %173 = vmatprep.subr.bf16.mxu0 %v680_v15 }
  0x1d   :  { %640 = vmatpush3.bf16.msra.mxu1 %v696_v30 }
  0x1e   :  { %641 = vmatprep.subr.bf16.mxu1 %v697_v31 }
  0x1f   :  { %174 = vmatpush1.bf16.msra.mxu0 %v682_v16 }
  0x21   :  { %642 = vmatpush3.bf16.msra.mxu1 %v698_v32 }
  0x22   :  { %192 = vmatmul.mubr.bf16.vlgmr.msra.gmra.mrb[0].mxu0 %v683_v17  ;;  %643 = vmatprep.subr.bf16.mxu1 %v699_v33 }
  0x23   :  { %201 = vmatprep.mubr.bf16.mxu0 %v705_v1 }
  0x25   :  { %644 = vmatpush3.bf16.msra.mxu1 %v700_v34 }
  0x2a   :  { %202 = vmatmul.mubr.bf16.gmra.mrb[4].mxu0 %v684_v18 }
  0xf5   :  { %v193_v42 = vpop.f32.mrb[0].mxu0 }
  0xf6   :  { %v864_v43 = vadd.f32 %v193_v42, %v60_v40  ;;  %v195_v44 = vpop.f32.mrb[1].mxu0 }
  0xf7   :  { %v867_v45 = vadd.f32 %v195_v44, %v862_v41  ;;  %v197_v46 = vpop.f32.mrb[2].mxu0 }
  0xf8   :  { %v869_v47 = vadd.f32 %v197_v46, %v60_v40  ;;  %v199_v48 = vpop.f32.mrb[3].mxu0  ;;  %v249_v51 = vmul.f32 %v864_v43, %v864_v43 }
  0xf9   :  { %v872_v49 = vadd.f32 %v199_v48, %v862_v41  ;;  %v250_v54 = vmul.f32 %v867_v45, %v867_v45 }
  0xfa   :  { %v229_v52 = vadd.f32 %v869_v47, %v864_v43  ;;  %v251_v53 = vmul.f32 %v869_v47, %v869_v47 }
  0xfb   :  { %v238_v55 = vadd.f32 %v872_v49, %v867_v45  ;;  %v252_v56 = vmul.f32 %v872_v49, %v872_v49 }
  0xfc   :  { %v257_v57 = vadd.f32 %v251_v53, %v249_v51 }
  0xfd   :  { %v266_v58 = vadd.f32 %v252_v56, %v250_v54  ;;  %v203_v59 = vpop.f32.mrb[4].mxu0  ;;  %v706_v54 = vmov 1966171168  }
  0xfe   :  { %v887_v60 = vadd.f32 %v203_v59, %v60_v40  ;;  %v205_v61 = vpop.f32.mrb[5].mxu0 }
  0xff   :  { %v890_v62 = vadd.f32 %v205_v61, %v862_v41  ;;  %v207_v63 = vpop.f32.mrb[6].mxu0 }
 0x100   :  { %v225_v0 = vsel %vm219_vm0, %v887_v60, 0.0  ;;  %v893_v1 = vadd.f32 %v207_v63, %v60_v40  ;;  %v209_v2 = vpop.f32.mrb[7].mxu0 }
 0x101   :  { %v230_v3 = vadd.f32 %v229_v52, %v225_v0  ;;  %v253_v4 = vmul.f32 %v225_v0, %v225_v0  ;;  %v226_v5 = vsel %vm219_vm0, %v890_v62, 0.0  ;;  %v283_v0 = vld [vmem:[%s934_s3] sm:$0x3] }
 0x102   :  { %v239_v6 = vadd.f32 %v238_v55, %v226_v5  ;;  %v254_v7 = vmul.f32 %v226_v5, %v226_v5  ;;  %v292_v55 = vunpack.c.l.s4 %v706_v54 }
 0x103   :  { %v232_v8 = vrot.slane %v230_v3, 4  ;;  %v258_v9 = vadd.f32 %v257_v57, %v253_v4 }
 0x104   :  { %v241_v10 = vrot.slane %v239_v6, 4  ;;  %v267_v11 = vadd.f32 %v266_v58, %v254_v7  ;;  %v293_v56 = vunpack.c.0.s8 %v292_v55  ;;  %v210_v7 = vadd.f32 %v209_v2, %v862_v41  ;;  %v307_v41 = vld [vmem:[%s935_s4] sm:$0x3] }
 0x105   :  { %v233_v12 = vadd.f32 %v232_v8, %v230_v3  ;;  %v260_v13 = vrot.slane %v258_v9, 4 }
 0x106   :  { %v242_v14 = vadd.f32 %v241_v10, %v239_v6  ;;  %v269_v15 = vrot.slane %v267_v11, 4  ;;  %v296_v58 = vsub.s32 %v293_v56, %v849_v36 }
 0x107   :  { %v234_v16 = vrot.slane %v233_v12, 2  ;;  %v261_v17 = vadd.f32 %v260_v13, %v258_v9 }
 0x108   :  { %v243_v18 = vrot.slane %v242_v14, 2  ;;  %v270_v19 = vadd.f32 %v269_v15, %v267_v11 }
 0x109   :  { %v235_v20 = vadd.f32 %v234_v16, %v233_v12  ;;  %v262_v21 = vrot.slane %v261_v17, 2 }
 0x10a   :  { %v244_v22 = vadd.f32 %v243_v18, %v242_v14  ;;  %v271_v23 = vrot.slane %v270_v19, 2 }
 0x10b   :  { %v236_v24 = vrot.slane %v235_v20, 1  ;;  %v263_v25 = vadd.f32 %v262_v21, %v261_v17 }
 0x10c   :  { %v245_v26 = vrot.slane %v244_v22, 1  ;;  %v272_v27 = vadd.f32 %v271_v23, %v270_v19 }
 0x10d   :  { %v237_v28 = vadd.f32 %v236_v24, %v235_v20  ;;  %v264_v29 = vrot.slane %v263_v25, 1 }
 0x10e   :  { %v246_v30 = vadd.f32 %v245_v26, %v244_v22  ;;  %v273_v31 = vrot.slane %v272_v27, 1 }
 0x10f   :  { %v247_v32 = vmul.f32 0.05, %v237_v28  ;;  %v265_v33 = vadd.f32 %v264_v29, %v263_v25 }
 0x110   :  { %v248_v34 = vmul.f32 0.05, %v246_v30  ;;  %v274_v35 = vadd.f32 %v273_v31, %v272_v27 }
 0x111   :  { %v275_v38 = vmul.f32 0.05, %v265_v33  ;;  %v277_v40 = vmul.f32 %v247_v32, %v247_v32 }
 0x112   :  { %v276_v42 = vmul.f32 0.05, %v274_v35  ;;  %v278_v44 = vmul.f32 %v248_v34, %v248_v34  ;;  %v628_v35 = vld [vmem:[%s936_s6] ss:$0 sm:$0xff] }
 0x113   :  { %v279_v46 = vsub.f32 %v275_v38, %v277_v40 }
 0x114   :  { %v280_v48 = vsub.f32 %v276_v42, %v278_v44 }
 0x115   :  { %v281_v50 = vmax.f32 %v279_v46, 0.0 }
 0x116   :  { %v282_v51 = vmax.f32 %v280_v48, 0.0 }
 0x117   :  { %v284_v52 = vadd.f32 1e-05, %v281_v50 }
 0x118   :  { %v285_v53 = vadd.f32 1e-05, %v282_v51 }
 0x119   :  { %701 = vrsqrt.f32 %v284_v52 }
 0x11a   :  { %703 = vrsqrt.f32 %v285_v53 }
 0x123   :  { %v702_v57 = vpop.eup %701 }
 0x124   :  { %v704_v59 = vpop.eup %703 }
 0x125   :  { %v290_v61 = vcombine.low %v702_v57, %v704_v59 }
 0x127   :  { %v297_v63 = vrot.slane %v290_v61, %v296_v58 }
 0x129   :  { %v304_v3 = vrot.slane %v297_v63, %v296_v58 }
 0x12b   :  { %v306_v4 = vmul.f32 %v304_v3, %v283_v0 }
 0x12d   :  { %v312_v5 = vrot.slane %v306_v4, %v852_v37  ;;  %v316_v6 = vrot.slane %v306_v4, %v858_v39 }
 0x12f   :  { %v319_v8 = vmul.f32 %v312_v5, %v247_v32  ;;  %v320_v9 = vmul.f32 %v316_v6, %v248_v34  ;;  %v345_v10 = vmul.f32 %v316_v6, %v890_v62  ;;  %v346_v36 = vmul.f32 %v312_v5, %v893_v1 }
 0x130   :  { %v347_v11 = vmul.f32 %v316_v6, %v210_v7  ;;  %v341_v12 = vmul.f32 %v316_v6, %v867_v45  ;;  %v343_v13 = vmul.f32 %v316_v6, %v872_v49  ;;  %v340_v14 = vmul.f32 %v312_v5, %v864_v43 }
 0x131   :  { %v323_v15 = vcombine.low %v319_v8, %v320_v9  ;;  %v342_v16 = vmul.f32 %v312_v5, %v869_v47  ;;  %v344_v17 = vmul.f32 %v312_v5, %v887_v60 }
 0x133   :  { %v330_v18 = vrot.slane %v323_v15, %v296_v58 }
 0x135   :  { %v337_v62 = vrot.slane %v330_v18, %v296_v58 }
 0x137   :  { %v339_v2 = vsub.f32 %v307_v41, %v337_v62 }
 0x139   :  { %v356_v1 = vrot.slane %v339_v2, %v858_v39  ;;  %v352_v45 = vrot.slane %v339_v2, %v852_v37 }
 0x13b   :  { %v364_v19 = vadd.f32 %v356_v1, %v345_v10  ;;  %v365_v49 = vadd.f32 %v352_v45, %v346_v36  ;;  %v366_v20 = vadd.f32 %v356_v1, %v347_v11  ;;  %v360_v43 = vadd.f32 %v356_v1, %v341_v12 }
 0x13c   :  { %v362_v21 = vadd.f32 %v356_v1, %v343_v13  ;;  %v359_v22 = vadd.f32 %v352_v45, %v340_v14  ;;  %v361_v47 = vadd.f32 %v352_v45, %v342_v16  ;;  %v363_v23 = vadd.f32 %v352_v45, %v344_v17 }
 0x13d   :  { %v372_v60 = vmax.f32 %v364_v19, 0.0  ;;  %v373_v24 = vmax.f32 %v365_v49, 0.0  ;;  %v374_v25 = vmax.f32 %v366_v20, 0.0  ;;  %v368_v26 = vmax.f32 %v360_v43, 0.0 }
 0x13e   :  { %v370_v27 = vmax.f32 %v362_v21, 0.0  ;;  %v367_v28 = vmax.f32 %v359_v22, 0.0  ;;  %v369_v29 = vmax.f32 %v361_v47, 0.0  ;;  %v371_v30 = vmax.f32 %v363_v23, 0.0 }
 0x13f   :  { %v382_v31 = vpack.c.bf16 %v374_v25, %v372_v60 }
 0x140   :  { %v380_v39 = vpack.c.bf16 %v370_v27, %v368_v26  ;;  %v379_v32 = vpack.c.bf16 %v369_v29, %v367_v28  ;;  %v381_v37 = vpack.c.bf16 %v373_v24, %v371_v30 }
 0x142   :  { %543 = vmatprep.mubr.bf16.mxu1 %v380_v39 }
 0x143   :  { %544 = vmatmul.mubr.bf16.vlgmr.msra.gmra.mrb[0].mxu1 %v379_v32 }
 0x144   :  { %551 = vmatprep.mubr.bf16.mxu1 %v382_v31 }
 0x14b   :  { %552 = vmatmul.mubr.bf16.gmra.mrb[4].mxu1 %v381_v37 }
 0x216   :  { %v645_v33 = vpop.f32.mrb[0].mxu1 }
 0x217   :  { %v646_v34 = vpop.f32.mrb[1].mxu1 }
 0x218   :  { %v647_v38 = vadd.f32 %v646_v34, %v645_v33  ;;  %v648_v40 = vpop.f32.mrb[2].mxu1 }
 0x219   :  { %v649_v42 = vpop.f32.mrb[3].mxu1 }
 0x21a   :  { %v582_v44 = vadd.f32 %v647_v38, %v628_v35  ;;  %v650_v46 = vadd.f32 %v649_v42, %v648_v40 }
 0x21c   :  { %586 = vst [vmem:[%s937_s7] sm:$0xff] %v582_v44  ;;  %v583_v48 = vadd.f32 %v650_v46, %v628_v35 }
 0x21e   :  { %587 = vst [vmem:[%s937_s7 + $0x8] sm:$0xff] %v583_v48  ;;  %v651_v50 = vpop.f32.mrb[4].mxu1 }
 0x21f   :  { %v652_v51 = vpop.f32.mrb[5].mxu1 }
 0x220   :  { %v653_v52 = vadd.f32 %v652_v51, %v651_v50  ;;  %v654_v53 = vpop.f32.mrb[6].mxu1 }
 0x221   :  { %v655_v54 = vpop.f32.mrb[7].mxu1 }
 0x222   :  { %v584_v55 = vadd.f32 %v653_v52, %v628_v35  ;;  %v656_v56 = vadd.f32 %v655_v54, %v654_v53 }
 0x224   :  { %588 = vst [vmem:[%s937_s7 + $0x10] sm:$0xff] %v584_v55  ;;  %v585_v57 = vadd.f32 %v656_v56, %v628_v35 }
 0x226   :  { %589 = vst [vmem:[%s937_s7 + $0x18] sm:$0xff] %v585_v57 }

</bundles_post_ra>
